<compile_context>
chip_gen: v5e
topology: v5e:2x2
jax: 0.10.0
libtpu: 0.0.40
codegen_flags: <defaults>
</compile_context>

<pallas_src>
import jax
import jax.numpy as jnp
from jax import lax
from jax.experimental import pallas as pl
from jax.experimental.pallas import tpu as pltpu


def _round_up(x, m):
    return ((x + m - 1) // m) * m


def value_net_kernel(obs_ref, w1_ref, b1_ref, w2_ref, b2_ref, w3_ref, b3_ref,
                     out_ref):
    """Fused 3-layer MLP.

    obs_ref : (tm, obs_dim)  native batch-major tile (contiguous HBM DMA)
    w*_ref  : PyTorch [out_features, in_features] layout (compute dtype)
    b*_ref  : (out_f, 1) float32
    out_ref : (1, tm)        lane-dense row of V(s)
    """
    x = obs_ref[...].astype(w1_ref.dtype)                    # (tm, obs_dim)

    # Layer 1: W1 @ x^T via dot_general trans_b -> (h1, tm), f32 accumulate.
    h = lax.dot_general(w1_ref[...], x, (((1,), (1,)), ((), ())),
                        preferred_element_type=jnp.float32)
    h = jnp.maximum(h + b1_ref[...], 0.0)

    # Layer 2: (h2, h1) @ (h1, tm) -> (h2, tm)
    h = jnp.dot(w2_ref[...], h.astype(w2_ref.dtype),
                preferred_element_type=jnp.float32)
    h = jnp.maximum(h + b2_ref[...], 0.0)

    # Head: (1, h2) @ (h2, tm) -> (1, tm); lane-dense result, no 1-wide column.
    v = jnp.dot(w3_ref[...], h.astype(w3_ref.dtype),
                preferred_element_type=jnp.float32)
    out_ref[...] = (v + b3_ref[...]).astype(out_ref.dtype)


def _block_vmem_bytes(shape, itemsize):
    """(8,128)-tile-padded VMEM footprint of a 2-D block (conservative)."""
    r = _round_up(max(int(shape[0]), 1), 8)
    c = _round_up(max(int(shape[1]), 1), 128)
    return r * c * max(int(itemsize), 4)   # sub-32-bit packs; over-count is ok


def _vmem_estimate(tm, obs_dim, h1, h2, obs_itemsize, w_itemsize,
                   weight_buffers):
    est = 2 * _block_vmem_bytes((tm, obs_dim), obs_itemsize)   # obs dbl buffer
    est += 2 * _block_vmem_bytes((1, tm), 4)                   # out dbl buffer
    wsum = (_block_vmem_bytes((h1, obs_dim), w_itemsize)
            + _block_vmem_bytes((h1, 1), 4)
            + _block_vmem_bytes((h2, h1), w_itemsize)
            + _block_vmem_bytes((h2, 1), 4)
            + _block_vmem_bytes((1, h2), w_itemsize)
            + _block_vmem_bytes((1, 1), 4))
    est += weight_buffers * wsum
    # In-kernel f32 intermediates (both hidden activations + head row).
    est += (_block_vmem_bytes((h1, tm), 4) + _block_vmem_bytes((h2, tm), 4)
            + _block_vmem_bytes((1, tm), 4))
    return est


def value_network_forward(obs, params, *, compute_dtype=jnp.float32,
                          max_tile=8192):
    """Run the ValueNetwork forward pass with a Pallas kernel.

    obs:    [B, obs_dim] (float32 or bfloat16) — consumed in native layout.
    params: dict with w1 [h1,obs_dim], b1 [h1,1], w2 [h2,h1], b2 [h2,1],
            w3 [1,h2], b3 [1,1]   (PyTorch nn.Linear layout, column biases)
    returns [B, 1] float32
    """
    B, obs_dim = obs.shape
    h1 = params["w1"].shape[0]
    h2 = params["w2"].shape[0]
    cd = jnp.dtype(compute_dtype)

    # Weights are tiny; cast once.  obs is NOT cast / transposed / padded in
    # the wrapper (that would be an extra full HBM pass over the dominant
    # array); the kernel casts each tile after the DMA.  Callers that already
    # store obs in bf16 get the halved HBM read for free.
    w1 = params["w1"].astype(cd)
    w2 = params["w2"].astype(cd)
    w3 = params["w3"].astype(cd)
    b1 = params["b1"].astype(jnp.float32)
    b2 = params["b2"].astype(jnp.float32)
    b3 = params["b3"].astype(jnp.float32)

    # Resident weights use a constant index_map; single-buffer them once they
    # are large enough for the wasted second VMEM buffer to matter (v7x has
    # only 64 MiB physical VMEM).
    weight_bytes = sum(int(a.size) * a.dtype.itemsize
                       for a in (w1, b1, w2, b2, w3, b3))
    weight_buffers = 1 if weight_bytes > (2 << 20) else 2

    # Batch tile = lane dim of every intermediate -> multiple of 128.
    # Aim for ~8 grid steps (>=2 per TensorCore on v7x), floor 1024 lanes for
    # large batches (amortizes ~0.35us/step pipeline overhead), never exceed
    # the batch, and respect an explicit VMEM budget.
    tm = _round_up(max((B + 7) // 8, 1), 128)
    tm = min(max(tm, 1024), max_tile)
    tm = min(tm, _round_up(B, 128))
    while tm > 128 and _vmem_estimate(tm, obs_dim, h1, h2,
                                      obs.dtype.itemsize, cd.itemsize,
                                      weight_buffers) > (24 << 20):
        tm = max(128, _round_up(tm // 2, 128))

    vmem_est = _vmem_estimate(tm, obs_dim, h1, h2, obs.dtype.itemsize,
                              cd.itemsize, weight_buffers)
    # Raise the scoped-VMEM default (16 MiB on v5e); stay under v7x's 64 MiB.
    vmem_limit = int(min(max(2 * vmem_est, 32 << 20), 56 << 20))

    grid = (pl.cdiv(B, tm),)   # ragged last block: OOB lanes masked on store

    def wspec(shape):
        if weight_buffers == 1:
            return pl.BlockSpec(shape, lambda i: (0, 0),
                                pipeline_mode=pl.Buffered(1))
        return pl.BlockSpec(shape, lambda i: (0, 0))

    out = pl.pallas_call(
        value_net_kernel,
        out_shape=jax.ShapeDtypeStruct((1, B), jnp.float32),
        grid_spec=pltpu.PrefetchScalarGridSpec(
            num_scalar_prefetch=0,
            grid=grid,
            in_specs=[
                pl.BlockSpec((tm, obs_dim), lambda i: (i, 0)),  # obs, native
                wspec((h1, obs_dim)), wspec((h1, 1)),
                wspec((h2, h1)), wspec((h2, 1)),
                wspec((1, h2)), wspec((1, 1)),
            ],
            out_specs=pl.BlockSpec((1, tm), lambda i: (0, i)),
        ),
        compiler_params=pltpu.CompilerParams(
            dimension_semantics=("parallel",),
            vmem_limit_bytes=vmem_limit),
    )(obs, w1, b1, w2, b2, w3, b3)

    return out.reshape(B, 1)


def init_params(key, obs_dim, hidden_sizes):
    """Deterministic PyTorch-style (uniform +-1/sqrt(fan_in)) init.

    Weights are [out_features, in_features]; biases are [out_features, 1].
    """
    sizes = [obs_dim] + list(hidden_sizes) + [1]
    params = {}
    for idx, (fan_in, fan_out) in enumerate(zip(sizes[:-1], sizes[1:]), start=1):
        key, kw, kb = jax.random.split(key, 3)
        bound = 1.0 / jnp.sqrt(fan_in)
        params[f"w{idx}"] = jax.random.uniform(
            kw, (fan_out, fan_in), jnp.float32, -bound, bound)
        params[f"b{idx}"] = jax.random.uniform(
            kb, (fan_out, 1), jnp.float32, -bound, bound)
    return params


def reference_forward(obs, params):
    h = jnp.maximum(obs @ params["w1"].T + params["b1"].T, 0.0)
    h = jnp.maximum(h @ params["w2"].T + params["b2"].T, 0.0)
    return h @ params["w3"].T + params["b3"].T


if __name__ == "__main__":
    obs_dim = 16
    hidden_sizes = [32, 32]
    batch = 300   # deliberately NOT a multiple of 128: exercises ragged block

    key = jax.random.PRNGKey(0)
    key, k_obs = jax.random.split(key)
    obs = jax.random.normal(k_obs, (batch, obs_dim), dtype=jnp.float32)
    params = init_params(key, obs_dim, hidden_sizes)

    v_ref = reference_forward(obs, params)

    # Exact-semantics path (f32 everywhere, matches the PyTorch module).
    v = jax.block_until_ready(value_network_forward(obs, params))
    assert v.shape == (batch, 1)
    assert jnp.allclose(v, v_ref, atol=1e-4, rtol=1e-4), "f32 mismatch vs ref"

    # Optional bf16-MXU path (f32 accumulation); looser tolerance.
    v_bf16 = jax.block_until_ready(
        value_network_forward(obs, params, compute_dtype=jnp.bfloat16))
    assert v_bf16.shape == (batch, 1)
    assert jnp.allclose(v_bf16, v_ref, atol=5e-2, rtol=5e-2), "bf16 mismatch"

    print("KERNEL_OK")
</pallas_src>

<mosaic_0001>
module attributes {stable_mosaic.version = 11 : i64} {
  func.func @value_net_kernel(%arg0: i32, %arg1: memref<384x16xf32, #tpu.memory_space<vmem>>, %arg2: memref<32x16xf32, #tpu.memory_space<vmem>>, %arg3: memref<32x1xf32, #tpu.memory_space<vmem>>, %arg4: memref<32x32xf32, #tpu.memory_space<vmem>>, %arg5: memref<32x1xf32, #tpu.memory_space<vmem>>, %arg6: memref<1x32xf32, #tpu.memory_space<vmem>>, %arg7: memref<1x1xf32, #tpu.memory_space<vmem>>, %arg8: memref<1x384xf32, #tpu.memory_space<vmem>>) attributes {dimension_semantics = [#tpu.dimension_semantics<parallel>], iteration_bounds = array<i64: 1>, scalar_prefetch = 0 : i64, scratch_operands = 0 : i64, tpu.core_type = #tpu.core_type<tc>, window_params = [{transform_indices = @transform_0, window_bounds = array<i64: 384, 16>}, {pipeline_mode = #tpu.pipeline_mode<synchronous>, transform_indices = @transform_1, window_bounds = array<i64: 32, 16>}, {pipeline_mode = #tpu.pipeline_mode<synchronous>, transform_indices = @transform_2, window_bounds = array<i64: 32, 1>}, {pipeline_mode = #tpu.pipeline_mode<synchronous>, transform_indices = @transform_3, window_bounds = array<i64: 32, 32>}, {pipeline_mode = #tpu.pipeline_mode<synchronous>, transform_indices = @transform_4, window_bounds = array<i64: 32, 1>}, {pipeline_mode = #tpu.pipeline_mode<synchronous>, transform_indices = @transform_5, window_bounds = array<i64: 1, 32>}, {pipeline_mode = #tpu.pipeline_mode<synchronous>, transform_indices = @transform_6, window_bounds = array<i64: 1, 1>}, {transform_indices = @transform_7, window_bounds = array<i64: 1, 384>}]} {
    %c0 = arith.constant 0 : index
    %c0_0 = arith.constant 0 : index
    %0 = vector.load %arg1[%c0, %c0_0] : memref<384x16xf32, #tpu.memory_space<vmem>>, vector<384x16xf32>
    %c0_1 = arith.constant 0 : index
    %c0_2 = arith.constant 0 : index
    %1 = vector.load %arg2[%c0_1, %c0_2] : memref<32x16xf32, #tpu.memory_space<vmem>>, vector<32x16xf32>
    %cst = arith.constant dense<0.000000e+00> : vector<32x384xf32>
    %2 = tpu.matmul %1, %0, %cst {dimension_numbers = #tpu.dot_dimension_numbers<[1], [1], [0], [0], [0, 0, 1, 0], [], []>} : vector<32x16xf32>, vector<384x16xf32>, vector<32x384xf32> -> vector<32x384xf32>
    %c0_3 = arith.constant 0 : index
    %c0_4 = arith.constant 0 : index
    %3 = vector.load %arg3[%c0_3, %c0_4] : memref<32x1xf32, #tpu.memory_space<vmem>>, vector<32x1xf32>
    %4 = vector.broadcast %3 : vector<32x1xf32> to vector<32x384xf32>
    %5 = arith.addf %2, %4 : vector<32x384xf32>
    %cst_5 = arith.constant 0.000000e+00 : f32
    %6 = vector.broadcast %cst_5 : f32 to vector<32x384xf32>
    %7 = arith.maximumf %5, %6 : vector<32x384xf32>
    %c0_6 = arith.constant 0 : index
    %c0_7 = arith.constant 0 : index
    %8 = vector.load %arg4[%c0_6, %c0_7] : memref<32x32xf32, #tpu.memory_space<vmem>>, vector<32x32xf32>
    %cst_8 = arith.constant dense<0.000000e+00> : vector<32x384xf32>
    %9 = tpu.matmul %8, %7, %cst_8 {dimension_numbers = #tpu.dot_dimension_numbers<[1], [0], [0], [1], [0, 0, 1, 1], [], []>} : vector<32x32xf32>, vector<32x384xf32>, vector<32x384xf32> -> vector<32x384xf32>
    %c0_9 = arith.constant 0 : index
    %c0_10 = arith.constant 0 : index
    %10 = vector.load %arg5[%c0_9, %c0_10] : memref<32x1xf32, #tpu.memory_space<vmem>>, vector<32x1xf32>
    %11 = vector.broadcast %10 : vector<32x1xf32> to vector<32x384xf32>
    %12 = arith.addf %9, %11 : vector<32x384xf32>
    %cst_11 = arith.constant 0.000000e+00 : f32
    %13 = vector.broadcast %cst_11 : f32 to vector<32x384xf32>
    %14 = arith.maximumf %12, %13 : vector<32x384xf32>
    %c0_12 = arith.constant 0 : index
    %c0_13 = arith.constant 0 : index
    %15 = vector.load %arg6[%c0_12, %c0_13] : memref<1x32xf32, #tpu.memory_space<vmem>>, vector<1x32xf32>
    %cst_14 = arith.constant dense<0.000000e+00> : vector<1x384xf32>
    %16 = tpu.matmul %15, %14, %cst_14 {dimension_numbers = #tpu.dot_dimension_numbers<[1], [0], [0], [1], [0, 0, 1, 1], [], []>} : vector<1x32xf32>, vector<32x384xf32>, vector<1x384xf32> -> vector<1x384xf32>
    %c0_15 = arith.constant 0 : index
    %c0_16 = arith.constant 0 : index
    %17 = vector.load %arg7[%c0_15, %c0_16] : memref<1x1xf32, #tpu.memory_space<vmem>>, vector<1x1xf32>
    %18 = vector.broadcast %17 : vector<1x1xf32> to vector<1x384xf32>
    %19 = arith.addf %16, %18 : vector<1x384xf32>
    %c0_17 = arith.constant 0 : index
    %c0_18 = arith.constant 0 : index
    %20 = vector.load %arg8[%c0_17, %c0_18] : memref<1x384xf32, #tpu.memory_space<vmem>>, vector<1x384xf32>
    tpu.vector_store %arg8[%c0_17, %c0_18], %19 {strides = array<i32>} : memref<1x384xf32, #tpu.memory_space<vmem>>, vector<1x384xf32>,
    return
  }
  func.func @transform_0(%arg0: i32) -> (i32, i32) {
    %c0_i32 = arith.constant 0 : i32
    %c0_i32_0 = arith.constant 0 : i32
    return %arg0, %c0_i32 : i32, i32
  }
  func.func @transform_1(%arg0: i32) -> (i32, i32) {
    %c0_i32 = arith.constant 0 : i32
    %c0_i32_0 = arith.constant 0 : i32
    %c0_i32_1 = arith.constant 0 : i32
    return %c0_i32, %c0_i32_0 : i32, i32
  }
  func.func @transform_2(%arg0: i32) -> (i32, i32) {
    %c0_i32 = arith.constant 0 : i32
    %c0_i32_0 = arith.constant 0 : i32
    %c0_i32_1 = arith.constant 0 : i32
    return %c0_i32, %c0_i32_0 : i32, i32
  }
  func.func @transform_3(%arg0: i32) -> (i32, i32) {
    %c0_i32 = arith.constant 0 : i32
    %c0_i32_0 = arith.constant 0 : i32
    %c0_i32_1 = arith.constant 0 : i32
    return %c0_i32, %c0_i32_0 : i32, i32
  }
  func.func @transform_4(%arg0: i32) -> (i32, i32) {
    %c0_i32 = arith.constant 0 : i32
    %c0_i32_0 = arith.constant 0 : i32
    %c0_i32_1 = arith.constant 0 : i32
    return %c0_i32, %c0_i32_0 : i32, i32
  }
  func.func @transform_5(%arg0: i32) -> (i32, i32) {
    %c0_i32 = arith.constant 0 : i32
    %c0_i32_0 = arith.constant 0 : i32
    %c0_i32_1 = arith.constant 0 : i32
    return %c0_i32, %c0_i32_0 : i32, i32
  }
  func.func @transform_6(%arg0: i32) -> (i32, i32) {
    %c0_i32 = arith.constant 0 : i32
    %c0_i32_0 = arith.constant 0 : i32
    %c0_i32_1 = arith.constant 0 : i32
    return %c0_i32, %c0_i32_0 : i32, i32
  }
  func.func @transform_7(%arg0: i32) -> (i32, i32) {
    %c0_i32 = arith.constant 0 : i32
    %c0_i32_0 = arith.constant 0 : i32
    return %c0_i32, %arg0 : i32, i32
  }
}

</mosaic_0001>

<bundles_post_ra>
// kernel: tpu_custom_call.1
= control target key start
LH: loop header
LB: loop body
LE: loop exit
PB: predicated region body
PF: predicated region fallthrough
CT: control target
= control target key end

     0   :  { %s1027_s0 = inlined_call_operand.vmem [shape: f32[300,16], index: 0, kind: input, shape index: {}]   ;;  %s1028_s1 = inlined_call_operand.vmem [shape: f32[32,16], index: 1, kind: input, shape index: {}]   ;;  %s1029_s2 = inlined_call_operand.vmem [shape: f32[32,1], index: 2, kind: input, shape index: {}]   ;;  %s1030_s3 = inlined_call_operand.vmem [shape: f32[32,32], index: 3, kind: input, shape index: {}]   ;;  %s1031_s4 = inlined_call_operand.vmem [shape: f32[32,1], index: 4, kind: input, shape index: {}]   ;;  %s1032_s5 = inlined_call_operand.vmem [shape: f32[1,32], index: 5, kind: input, shape index: {}]   ;;  %s1033_s6 = inlined_call_operand.<no memory space> [shape: f32[1,1], index: 6, kind: input, shape index: {}]   ;;  %s1034_s7 = inlined_call_operand.hbm [shape: f32[1,300], index: 7, kind: output, shape index: {}]  }
   0x1   :  { %v12_v0 = vstv %s1033_s6 }
   0x2   :  { %13 = vst [vmem:[#allocation2] sm:$0x1] %v12_v0 }
   0x3   :  { %v44_v1 = vld [vmem:[%s1027_s0 + $0x78] sm:$0xff]  ;;  %vm105_vm0 = vcmask 130048   ;;  %v43_v4 = vld [vmem:[%s1027_s0 + $0x70] sm:$0xff]  ;;  %v42_v7 = vld [vmem:[%s1027_s0 + $0x68] sm:$0xff] }
   0x4   :  { %v60_v2 = vld [vmem:[%s1027_s0 + $0xf8] sm:$0xff]  ;;  %603 = vmatpush.xpose.msk.msra.mxu0 %vm105_vm0, %v44_v1  ;;  %v59_v5 = vld [vmem:[%s1027_s0 + $0xf0] sm:$0xff]  ;;  %v58_v8 = vld [vmem:[%s1027_s0 + $0xe8] sm:$0xff] }
   0x5   :  { %v76_v3 = vld [vmem:[%s1027_s0 + $0x178] sm:$0xff]  ;;  %623 = vmatpush.xpose.msk.msra.mxu1 %vm105_vm0, %v60_v2  ;;  %v75_v6 = vld [vmem:[%s1027_s0 + $0x170] sm:$0xff]  ;;  %v74_v9 = vld [vmem:[%s1027_s0 + $0x168] sm:$0xff] }
   0x6   :  { %643 = vmatpush.xpose.msk.msra.mxu2 %vm105_vm0, %v76_v3  ;;  %v41_v10 = vld [vmem:[%s1027_s0 + $0x60] sm:$0xff] }
   0x7   :  { %v57_v11 = vld [vmem:[%s1027_s0 + $0xe0] sm:$0xff] }
   0x8   :  { %604 = vmatpush.xpose.msk.msra.mxu0 %vm105_vm0, %v43_v4  ;;  %v73_v12 = vld [vmem:[%s1027_s0 + $0x160] sm:$0xff] }
   0x9   :  { %624 = vmatpush.xpose.msk.msra.mxu1 %vm105_vm0, %v59_v5 }
   0xa   :  { %644 = vmatpush.xpose.msk.msra.mxu2 %vm105_vm0, %v75_v6 }
   0xc   :  { %605 = vmatpush.xpose.msk.msra.mxu0 %vm105_vm0, %v42_v7 }
   0xd   :  { %625 = vmatpush.xpose.msk.msra.mxu1 %vm105_vm0, %v58_v8 }
   0xe   :  { %645 = vmatpush.xpose.msk.msra.mxu2 %vm105_vm0, %v74_v9 }
   0xf   :  { %14 = vsyncpa [#allocation4], 0  ;;  %v40_v13 = vld [vmem:[%s1027_s0 + $0x58] sm:$0xff]  ;;  %v39_v16 = vld [vmem:[%s1027_s0 + $0x50] sm:$0xff]  ;;  %v709_v31 = vmov 0   ;;  %vm389_vm1 = vcmask 261120  }
  0x10   :  { %606 = vmatpush.xpose.msk.msra.mxu0 %vm105_vm0, %v41_v10  ;;  %v56_v14 = vld [vmem:[%s1027_s0 + $0xd8] sm:$0xff]  ;;  %v55_v17 = vld [vmem:[%s1027_s0 + $0xd0] sm:$0xff]  ;;  %v38_v19 = vld [vmem:[%s1027_s0 + $0x48] sm:$0xff]  ;;  %681 = vset.pattern.permute.xlu1 %v709_v31  ;;  %vm577_vm2 = vcmask 1040384   ;;  %s594_s9 = sshll.u32 %s1034_s7, 4  ;;  %vm579_vm3 = vcmask 1041408   ;;  %s595_s9 = int_to_ptr.hbm [resolvable:$true] %s594_s9 }
  0x11   :  { %626 = vmatpush.xpose.msk.msra.mxu1 %vm105_vm0, %v57_v11  ;;  %v72_v15 = vld [vmem:[%s1027_s0 + $0x158] sm:$0xff]  ;;  %v71_v18 = vld [vmem:[%s1027_s0 + $0x150] sm:$0xff]  ;;  %v54_v20 = vld [vmem:[%s1027_s0 + $0xc8] sm:$0xff]  ;;  %680 = vset.pattern.permute.xlu0 %v709_v31 }
  0x12   :  { %646 = vmatpush.xpose.msk.msra.mxu2 %vm105_vm0, %v73_v12  ;;  %v70_v21 = vld [vmem:[%s1027_s0 + $0x148] sm:$0xff]  ;;  %v37_v22 = vld [vmem:[%s1027_s0 + $0x40] sm:$0xff]  ;;  %v36_v25 = vld [vmem:[%s1027_s0 + $0x38] sm:$0xff]  ;;  %682 = vset.pattern.permute.xlu2 %v709_v31 }
  0x13   :  { %v53_v23 = vld [vmem:[%s1027_s0 + $0xc0] sm:$0xff]  ;;  %v52_v26 = vld [vmem:[%s1027_s0 + $0xb8] sm:$0xff]  ;;  %v82_v28 = vld [vmem:[%s1029_s2 + $0x8] sm:$0xff] }
  0x14   :  { %607 = vmatpush.xpose.msk.msra.mxu0 %vm105_vm0, %v40_v13  ;;  %v69_v24 = vld [vmem:[%s1027_s0 + $0x140] sm:$0xff]  ;;  %v68_v27 = vld [vmem:[%s1027_s0 + $0x138] sm:$0xff]  ;;  %v35_v29 = vld [vmem:[%s1027_s0 + $0x30] sm:$0xff]  ;;  %92 = vperm.xlu1 %681, %v82_v28  }
  0x15   :  { %627 = vmatpush.xpose.msk.msra.mxu1 %vm105_vm0, %v56_v14  ;;  %v51_v30 = vld [vmem:[%s1027_s0 + $0xb0] sm:$0xff]  ;;  %v34_v33 = vld [vmem:[%s1027_s0 + $0x28] sm:$0xff]  ;;  %v81_v36 = vld [vmem:[%s1029_s2] sm:$0xff] }
  0x16   :  { %647 = vmatpush.xpose.msk.msra.mxu2 %vm105_vm0, %v72_v15  ;;  %v67_v32 = vld [vmem:[%s1027_s0 + $0x130] sm:$0xff]  ;;  %v50_v34 = vld [vmem:[%s1027_s0 + $0xa8] sm:$0xff]  ;;  %v84_v37 = vld [vmem:[%s1029_s2 + $0x18] sm:$0xff] }
  0x17   :  { %v66_v35 = vld [vmem:[%s1027_s0 + $0x128] sm:$0xff]  ;;  %v33_v38 = vld [vmem:[%s1027_s0 + $0x20] sm:$0xff]  ;;  %102 = vperm.xlu0 %680, %v84_v37   ;;  %v32_v41 = vld [vmem:[%s1027_s0 + $0x18] sm:$0xff] }
  0x18   :  { %608 = vmatpush.xpose.msk.msra.mxu0 %vm105_vm0, %v39_v16  ;;  %v49_v39 = vld [vmem:[%s1027_s0 + $0xa0] sm:$0xff]  ;;  %v48_v42 = vld [vmem:[%s1027_s0 + $0x98] sm:$0xff]  ;;  %v83_v44 = vld [vmem:[%s1029_s2 + $0x10] sm:$0xff] }
  0x19   :  { %628 = vmatpush.xpose.msk.msra.mxu1 %vm105_vm0, %v55_v17  ;;  %v65_v40 = vld [vmem:[%s1027_s0 + $0x120] sm:$0xff]  ;;  %v64_v43 = vld [vmem:[%s1027_s0 + $0x118] sm:$0xff]  ;;  %v31_v45 = vld [vmem:[%s1027_s0 + $0x10] sm:$0xff] }
  0x1a   :  { %648 = vmatpush.xpose.msk.msra.mxu2 %vm105_vm0, %v71_v18  ;;  %v47_v46 = vld [vmem:[%s1027_s0 + $0x90] sm:$0xff]  ;;  %v30_v48 = vld [vmem:[%s1027_s0 + $0x8] sm:$0xff]  ;;  %v365_v52 = vld [vmem:[%s1031_s4] sm:$0xff] }
  0x1b   :  { %v63_v47 = vld [vmem:[%s1027_s0 + $0x110] sm:$0xff]  ;;  %v46_v49 = vld [vmem:[%s1027_s0 + $0x88] sm:$0xff]  ;;  %v29_v53 = vld [vmem:[%s1027_s0] sm:$0xff] }
  0x1c   :  { %609 = vmatpush.xpose.msk.msra.mxu0 %vm105_vm0, %v38_v19  ;;  %87 = vperm.xlu1 %681, %v81_v36   ;;  %v62_v50 = vld [vmem:[%s1027_s0 + $0x108] sm:$0xff]  ;;  %v45_v54 = vld [vmem:[%s1027_s0 + $0x80] sm:$0xff]  ;;  %v79_v58 = vld [vmem:[%s1028_s1 + $0x10] sm:$0xff] }
  0x1d   :  { %629 = vmatpush.xpose.msk.msra.mxu1 %vm105_vm0, %v54_v20  ;;  %v366_v51 = vld [vmem:[%s1031_s4 + $0x8] sm:$0xff]  ;;  %v61_v55 = vld [vmem:[%s1027_s0 + $0x100] sm:$0xff]  ;;  %v80_v59 = vld [vmem:[%s1028_s1 + $0x18] sm:$0xff] }
  0x1e   :  { %649 = vmatpush.xpose.msk.msra.mxu2 %vm105_vm0, %v70_v21  ;;  %v77_v56 = vld [vmem:[%s1028_s1] sm:$0xff]  ;;  %v78_v57 = vld [vmem:[%s1028_s1 + $0x8] sm:$0xff] }
  0x1f   :  { %97 = vperm.xlu0 %680, %v83_v44   ;;  %v361_v21 = vld [vmem:[%s1030_s3] sm:$0xff] }
  0x20   :  { %610 = vmatpush.xpose.msk.msra.mxu0 %vm105_vm0, %v37_v22 }
  0x21   :  { %630 = vmatpush.xpose.msk.msra.mxu1 %vm105_vm0, %v53_v23 }
  0x22   :  { %650 = vmatpush.xpose.msk.msra.mxu2 %vm105_vm0, %v69_v24 }
  0x24   :  { %611 = vmatpush.xpose.msk.msra.mxu0 %vm105_vm0, %v36_v25  ;;  %371 = vperm.xlu1 %681, %v365_v52  }
  0x25   :  { %631 = vmatpush.xpose.msk.msra.mxu1 %vm105_vm0, %v52_v26 }
  0x26   :  { %651 = vmatpush.xpose.msk.msra.mxu2 %vm105_vm0, %v68_v27 }
  0x27   :  { %376 = vperm.xlu0 %680, %v366_v51  }
  0x28   :  { %612 = vmatpush.xpose.msk.msra.mxu0 %vm105_vm0, %v35_v29 }
  0x29   :  { %632 = vmatpush.xpose.msk.msra.mxu1 %vm105_vm0, %v51_v30 }
  0x2a   :  { %652 = vmatpush.xpose.msk.msra.mxu2 %vm105_vm0, %v67_v32 }
  0x2c   :  { %613 = vmatpush.xpose.msk.msra.mxu0 %vm105_vm0, %v34_v33  ;;  %v362_v33 = vld [vmem:[%s1030_s3 + $0x8] sm:$0xff] }
  0x2d   :  { %633 = vmatpush.xpose.msk.msra.mxu1 %vm105_vm0, %v50_v34 }
  0x2e   :  { %653 = vmatpush.xpose.msk.msra.mxu2 %vm105_vm0, %v66_v35 }
  0x30   :  { %614 = vmatpush.xpose.msk.msra.mxu0 %vm105_vm0, %v33_v38  ;;  %v363_v38 = vld [vmem:[%s1030_s3 + $0x10] sm:$0xff] }
  0x31   :  { %634 = vmatpush.xpose.msk.msra.mxu1 %vm105_vm0, %v49_v39  ;;  %v368_v39 = vld [vmem:[%s1031_s4 + $0x18] sm:$0xff] }
  0x32   :  { %654 = vmatpush.xpose.msk.msra.mxu2 %vm105_vm0, %v65_v40  ;;  %386 = vperm.xlu2 %682, %v368_v39   ;;  %v364_v40 = vld [vmem:[%s1030_s3 + $0x18] sm:$0xff] }
  0x34   :  { %615 = vmatpush.xpose.msk.msra.mxu0 %vm105_vm0, %v32_v41  ;;  %v367_v41 = vld [vmem:[%s1031_s4 + $0x10] sm:$0xff] }
  0x35   :  { %635 = vmatpush.xpose.msk.msra.mxu1 %vm105_vm0, %v48_v42  ;;  %v502_v42 = vld [vmem:[#allocation2] sm:$0x1] }
  0x36   :  { %655 = vmatpush.xpose.msk.msra.mxu2 %vm105_vm0, %v64_v43 }
  0x38   :  { %616 = vmatpush.xpose.msk.msra.mxu0 %vm105_vm0, %v31_v45 }
  0x39   :  { %636 = vmatpush.xpose.msk.msra.mxu1 %vm105_vm0, %v47_v46 }
  0x3a   :  { %656 = vmatpush.xpose.msk.msra.mxu2 %vm105_vm0, %v63_v47  ;;  %381 = vperm.xlu2 %682, %v367_v41  }
  0x3c   :  { %617 = vmatpush.xpose.msk.msra.mxu0 %vm105_vm0, %v30_v48 }
  0x3d   :  { %637 = vmatpush.xpose.msk.msra.mxu1 %vm105_vm0, %v46_v49 }
  0x3e   :  { %657 = vmatpush.xpose.msk.msra.mxu2 %vm105_vm0, %v62_v50 }
  0x40   :  { %618 = vmatpush.xpose.msk.msra.mxu0 %vm105_vm0, %v29_v53 }
  0x41   :  { %638 = vmatpush.xpose.msk.msra.mxu1 %vm105_vm0, %v45_v54 }
  0x42   :  { %658 = vmatpush.xpose.msk.msra.mxu2 %vm105_vm0, %v61_v55  ;;  %505 = vperm.xlu2 %682, %v502_v42  }
  0x43   :  { %619 = vmatmul.msk.f32.vlgmr.msra.gmra.mxu0 %vm105_vm0, %v77_v56 }
  0x44   :  { %639 = vmatmul.msk.f32.vlgmr.msra.gmra.mxu1 %vm105_vm0, %v77_v56 }
  0x45   :  { %659 = vmatmul.msk.f32.vlgmr.msra.gmra.mxu2 %vm105_vm0, %v77_v56 }
  0x4b   :  { %620 = vmatmul.msk.f32.gmra.mxu0 %vm105_vm0, %v78_v57 }
  0x4c   :  { %640 = vmatmul.msk.f32.gmra.mxu1 %vm105_vm0, %v78_v57 }
  0x4d   :  { %660 = vmatmul.msk.f32.gmra.mxu2 %vm105_vm0, %v78_v57 }
  0x53   :  { %621 = vmatmul.msk.f32.gmra.mxu0 %vm105_vm0, %v79_v58 }
  0x54   :  { %641 = vmatmul.msk.f32.gmra.mxu1 %vm105_vm0, %v79_v58 }
  0x55   :  { %661 = vmatmul.msk.f32.gmra.mxu2 %vm105_vm0, %v79_v58 }
  0x5b   :  { %622 = vmatmul.msk.f32.gmra.mxu0 %vm105_vm0, %v80_v59 }
  0x5c   :  { %642 = vmatmul.msk.f32.gmra.mxu1 %vm105_vm0, %v80_v59 }
  0x5d   :  { %662 = vmatmul.msk.f32.gmra.mxu2 %vm105_vm0, %v80_v59 }
  0x86   :  { %v93_v3 = vpop.permute.xlu1 %92 }
  0x89   :  { %v103_v1 = vpop.permute.xlu0 %102 }
  0x8c   :  { %v387_v45 = vpop.permute.xlu2 %386 }
  0x8e   :  { %v88_v11 = vpop.permute.xlu1 %87 }
  0x91   :  { %v98_v6 = vpop.permute.xlu0 %97 }
  0x94   :  { %v382_v47 = vpop.permute.xlu2 %381 }
  0x96   :  { %v372_v54 = vpop.permute.xlu1 %371 }
  0x99   :  { %v377_v51 = vpop.permute.xlu0 %376 }
  0xc0   :  { %v279_v60 = vpop.f32.mrf.mxu0 }
  0xc1   :  { %v308_v61 = vpop.f32.mrf.mxu1  ;;  %v280_v15 = vadd.f32 %v279_v60, %v88_v11  ;;  %v501_v60 = vld [vmem:[%s1032_s5] sm:$0x1]  ;;  %s710_s5 = smov [#allocation3]  }
  0xc2   :  { %v309_v25 = vadd.f32 %v308_v61, %v88_v11  ;;  %s592_s30 = sshll.u32 %s710_s5, 4  ;;  %s593_s30 = int_to_ptr.vmem [resolvable:$true] %s592_s30 }
  0xc3   :  { %v349_v19 = vmax.f32 %v280_v15, 0.0 }
  0xc4   :  { %v350_v30 = vmax.f32 %v309_v25, 0.0  ;;  %v582_v25 = vlaneseq }
  0xc6   :  { %vm584_vm4 = vcmp.lt.s32.totalorder %v582_v25, 384 }
  0xc8   :  { %v337_v62 = vpop.f32.mrf.mxu2  ;;  %v282_v63 = vpop.f32.mrf.mxu0 }
  0xc9   :  { %v311_v0 = vpop.f32.mrf.mxu1  ;;  %v283_v12 = vadd.f32 %v282_v63, %v93_v3  ;;  %v338_v34 = vadd.f32 %v337_v62, %v88_v11 }
  0xca   :  { %v312_v22 = vadd.f32 %v311_v0, %v93_v3 }
  0xcb   :  { %v352_v17 = vmax.f32 %v283_v12, 0.0  ;;  %v351_v37 = vmax.f32 %v338_v34, 0.0 }
  0xcc   :  { %v353_v28 = vmax.f32 %v312_v22, 0.0 }
  0xd0   :  { %v340_v2 = vpop.f32.mrf.mxu2  ;;  %v285_v4 = vpop.f32.mrf.mxu0 }
  0xd1   :  { %v314_v5 = vpop.f32.mrf.mxu1  ;;  %v286_v8 = vadd.f32 %v285_v4, %v98_v6  ;;  %v341_v31 = vadd.f32 %v340_v2, %v93_v3 }
  0xd2   :  { %v315_v20 = vadd.f32 %v314_v5, %v98_v6 }
  0xd3   :  { %v355_v16 = vmax.f32 %v286_v8, 0.0  ;;  %v354_v36 = vmax.f32 %v341_v31, 0.0 }
  0xd4   :  { %v356_v26 = vmax.f32 %v315_v20, 0.0  ;;  %v506_v20 = vpop.permute.xlu2 %505 }
  0xd5   :  { %v508_v22 = vperm.slane %v506_v20, 0 }
  0xd8   :  { %v288_v7 = vpop.f32.mrf.mxu0  ;;  %v343_v9 = vpop.f32.mrf.mxu2 }
  0xd9   :  { %v289_v10 = vadd.f32 %v288_v7, %v103_v1  ;;  %v317_v14 = vpop.f32.mrf.mxu1  ;;  %v344_v29 = vadd.f32 %v343_v9, %v98_v6 }
  0xda   :  { %v318_v18 = vadd.f32 %v317_v14, %v103_v1 }
  0xdb   :  { %v358_v13 = vmax.f32 %v289_v10, 0.0  ;;  %v357_v35 = vmax.f32 %v344_v29, 0.0 }
  0xdc   :  { %v359_v23 = vmax.f32 %v318_v18, 0.0 }
  0xdd   :  { %414 = vmatpush.msra.mxu3 %v358_v13 }
  0xdf   :  { %415 = vmatpush.msra.mxu3 %v355_v16 }
  0xe0   :  { %v346_v24 = vpop.f32.mrf.mxu2 }
  0xe1   :  { %416 = vmatpush.msra.mxu3 %v352_v17  ;;  %v347_v27 = vadd.f32 %v346_v24, %v103_v1 }
  0xe3   :  { %417 = vmatpush.msra.mxu3 %v349_v19  ;;  %v360_v32 = vmax.f32 %v347_v27, 0.0 }
  0xe4   :  { %663 = vmatmul.msk.f32.vlgmr.msra.gmra.mxu3 %vm389_vm1, %v361_v21 }
  0xe5   :  { %443 = vmatpush.msrb.mxu3 %v359_v23 }
  0xe7   :  { %444 = vmatpush.msrb.mxu3 %v356_v26 }
  0xe9   :  { %445 = vmatpush.msrb.mxu3 %v353_v28 }
  0xeb   :  { %446 = vmatpush.msrb.mxu3 %v350_v30 }
  0xec   :  { %664 = vmatmul.msk.f32.gmra.mxu3 %vm389_vm1, %v362_v33 }
  0xed   :  { %472 = vmatpush.msra.mxu3 %v360_v32 }
  0xef   :  { %473 = vmatpush.msra.mxu3 %v357_v35 }
  0xf1   :  { %474 = vmatpush.msra.mxu3 %v354_v36 }
  0xf3   :  { %475 = vmatpush.msra.mxu3 %v351_v37 }
  0xf4   :  { %665 = vmatmul.msk.f32.gmra.mxu3 %vm389_vm1, %v363_v38 }
  0xfc   :  { %666 = vmatmul.msk.f32.gmra.mxu3 %vm389_vm1, %v364_v40 }
 0x104   :  { %667 = vmatmul.msk.f32.vlgmr.msrb.gmra.mxu3 %vm389_vm1, %v361_v21 }
 0x10c   :  { %668 = vmatmul.msk.f32.gmra.mxu3 %vm389_vm1, %v362_v33 }
 0x114   :  { %669 = vmatmul.msk.f32.gmra.mxu3 %vm389_vm1, %v363_v38 }
 0x11c   :  { %670 = vmatmul.msk.f32.gmra.mxu3 %vm389_vm1, %v364_v40 }
 0x124   :  { %671 = vmatmul.msk.f32.vlgmr.msra.gmra.mxu3 %vm389_vm1, %v361_v21 }
 0x12c   :  { %672 = vmatmul.msk.f32.gmra.mxu3 %vm389_vm1, %v362_v33 }
 0x134   :  { %673 = vmatmul.msk.f32.gmra.mxu3 %vm389_vm1, %v363_v38 }
 0x13c   :  { %674 = vmatmul.msk.f32.gmra.mxu3 %vm389_vm1, %v364_v40 }
 0x167   :  { %v419_v43 = vpop.f32.mrf.mxu3 }
 0x168   :  { %v420_v55 = vadd.f32 %v419_v43, %v372_v54 }
 0x16a   :  { %v489_v59 = vmax.f32 %v420_v55, 0.0 }
 0x16f   :  { %v422_v44 = vpop.f32.mrf.mxu3 }
 0x170   :  { %v423_v52 = vadd.f32 %v422_v44, %v377_v51 }
 0x172   :  { %v492_v57 = vmax.f32 %v423_v52, 0.0 }
 0x177   :  { %v425_v46 = vpop.f32.mrf.mxu3 }
 0x178   :  { %v426_v49 = vadd.f32 %v425_v46, %v382_v47 }
 0x17a   :  { %v495_v56 = vmax.f32 %v426_v49, 0.0 }
 0x17f   :  { %v428_v48 = vpop.f32.mrf.mxu3 }
 0x180   :  { %v429_v50 = vadd.f32 %v428_v48, %v387_v45 }
 0x182   :  { %v498_v53 = vmax.f32 %v429_v50, 0.0 }
 0x184   :  { %524 = vmatpush.msrb.mxu0 %v498_v53 }
 0x186   :  { %525 = vmatpush.msrb.mxu0 %v495_v56 }
 0x187   :  { %v448_v58 = vpop.f32.mrf.mxu3 }
 0x188   :  { %526 = vmatpush.msrb.mxu0 %v492_v57  ;;  %v449_v4 = vadd.f32 %v448_v58, %v372_v54 }
 0x18a   :  { %527 = vmatpush.msrb.mxu0 %v489_v59  ;;  %v490_v8 = vmax.f32 %v449_v4, 0.0 }
 0x18b   :  { %675 = vmatmul.msk.f32.vlgmr.msrb.gmra.mxu0 %vm389_vm1, %v501_v60 }
 0x18f   :  { %v451_v61 = vpop.f32.mrf.mxu3 }
 0x190   :  { %v452_v2 = vadd.f32 %v451_v61, %v377_v51 }
 0x192   :  { %v493_v6 = vmax.f32 %v452_v2, 0.0 }
 0x197   :  { %v454_v62 = vpop.f32.mrf.mxu3 }
 0x198   :  { %v455_v0 = vadd.f32 %v454_v62, %v382_v47 }
 0x19a   :  { %v496_v5 = vmax.f32 %v455_v0, 0.0 }
 0x19f   :  { %v457_v63 = vpop.f32.mrf.mxu3 }
 0x1a0   :  { %v458_v1 = vadd.f32 %v457_v63, %v387_v45 }
 0x1a2   :  { %v499_v3 = vmax.f32 %v458_v1, 0.0 }
 0x1a4   :  { %544 = vmatpush.msrb.mxu1 %v499_v3 }
 0x1a6   :  { %545 = vmatpush.msrb.mxu1 %v496_v5 }
 0x1a7   :  { %v477_v7 = vpop.f32.mrf.mxu3 }
 0x1a8   :  { %546 = vmatpush.msrb.mxu1 %v493_v6  ;;  %v478_v16 = vadd.f32 %v477_v7, %v372_v54 }
 0x1aa   :  { %547 = vmatpush.msrb.mxu1 %v490_v8  ;;  %v491_v19 = vmax.f32 %v478_v16, 0.0 }
 0x1ab   :  { %676 = vmatmul.msk.f32.vlgmr.msrb.gmra.mxu1 %vm389_vm1, %v501_v60 }
 0x1af   :  { %v480_v9 = vpop.f32.mrf.mxu3 }
 0x1b0   :  { %v481_v14 = vadd.f32 %v480_v9, %v377_v51 }
 0x1b2   :  { %v494_v18 = vmax.f32 %v481_v14, 0.0 }
 0x1b7   :  { %v483_v10 = vpop.f32.mrf.mxu3 }
 0x1b8   :  { %v484_v12 = vadd.f32 %v483_v10, %v382_v47 }
 0x1ba   :  { %v497_v17 = vmax.f32 %v484_v12, 0.0 }
 0x1bf   :  { %v486_v11 = vpop.f32.mrf.mxu3 }
 0x1c0   :  { %v487_v13 = vadd.f32 %v486_v11, %v387_v45 }
 0x1c2   :  { %v500_v15 = vmax.f32 %v487_v13, 0.0 }
 0x1c4   :  { %564 = vmatpush.msrb.mxu2 %v500_v15 }
 0x1c6   :  { %565 = vmatpush.msrb.mxu2 %v497_v17 }
 0x1c8   :  { %566 = vmatpush.msrb.mxu2 %v494_v18 }
 0x1ca   :  { %567 = vmatpush.msrb.mxu2 %v491_v19 }
 0x1cb   :  { %677 = vmatmul.msk.f32.vlgmr.msrb.gmra.mxu2 %vm389_vm1, %v501_v60 }
 0x208   :  { %v529_v24 = vpop.f32.mrf.mxu0 }
 0x209   :  { %v530_v29 = vadd.f32 %v529_v24, %v508_v22 }
 0x228   :  { %v549_v21 = vpop.f32.mrf.mxu1 }
 0x229   :  { %v550_v23 = vadd.f32 %v549_v21, %v508_v22 }
 0x22b   :  { %v575_v26 = vrot.slane %v550_v23, 7 }
 0x22d   :  { %v578_v31 = vsel %vm577_vm2, %v530_v29, %v575_v26 }
 0x24e   :  { %v569_v27 = vpop.f32.mrf.mxu2 }
 0x24f   :  { %v570_v28 = vadd.f32 %v569_v27, %v508_v22 }
 0x251   :  { %v576_v30 = vrot.slane %v570_v28, 6 }
 0x253   :  { %v580_v32 = vsel %vm579_vm3, %v578_v31, %v576_v30 }
 0x254   :  { %586 = vst.msk [vmem:[#allocation3] sm:$0x7] %vm584_vm4, %v580_v32 }
 0x255   :  { %597 = dma.vmem_to_hbm [thread:$0]  %s593_s30, 48, %s595_s9, [#allocation4]  }
 0x256   :  { %707 = dma.done.wait [#allocation4], 48  }
 0x257   :  { %708 = vsyncadd [#allocation4], 4294967248 }
 0x258   :  { %602 = vsyncpa [#allocation4], 1 }

</bundles_post_ra>
